<compile_context>
chip_gen: v7x
topology: tpu7x:2x2x1
jax: 0.10.0
libtpu: 0.0.40
codegen_flags: <defaults>
</compile_context>

<pallas_src>
import functools

import jax
import jax.numpy as jnp
from jax.experimental import pallas as pl
from jax.experimental.pallas import tpu as pltpu


# ---------------------------------------------------------------------------
# Kernel
# ---------------------------------------------------------------------------
def transformer3_kernel(enc_ref, p_ref, g_ref, lflat_ref,
                        w1_ref, wp_ref, bcat_ref, wl_ref, bl_ref,
                        w2_ref, b2_ref, out_ref):
    # cat([dense_1(enc), fc_p(p)]): two dots into disjoint column halves of a
    # pre-packed 32-wide weight (cols 0..15 <- w1, cols 16..31 <- wp).
    cat = (jnp.dot(enc_ref[...], w1_ref[...], preferred_element_type=jnp.float32)
           + jnp.dot(p_ref[...], wp_ref[...], preferred_element_type=jnp.float32)
           + bcat_ref[...])                                        # [TB, 32]

    # l-path with the seq-sum folded into the matmul:
    #   [TB, S*116] @ tile(wl, (S,1)) == (sum_s l[:, s, :]) @ wl
    lo = jnp.dot(lflat_ref[...], wl_ref[...],
                 preferred_element_type=jnp.float32) + bl_ref[...]  # [TB, 32]

    gate = g_ref[...]
    f_o = gate * cat + (1.0 - gate) * lo                            # [TB, 32]

    # dense_2 into an 8-lane slab (w2/b2 zero padded beyond col 2).
    out_ref[...] = jnp.dot(f_o, w2_ref[...],
                           preferred_element_type=jnp.float32) + b2_ref[...]


# ---------------------------------------------------------------------------
# One-time parameter packing (hoisted out of the forward)
# ---------------------------------------------------------------------------
def pack_params(params, seq_len, l_dtype=jnp.float32):
    """Pack module weights into the kernel layout. Call ONCE per params/seq_len.

    l_dtype=jnp.bfloat16 halves the dominant l-stream HBM traffic (~1.5x faster)
    at a small precision cost vs. the f32 PyTorch reference.
    """
    w1, b1, wp, bp, wl, bl, w2, b2 = params
    # dense_1 / fc_p write disjoint halves of the 32-wide 'cat' activation.
    w1p = jnp.zeros((192, 32), jnp.float32).at[:, :16].set(w1)
    wpp = jnp.zeros((3, 32), jnp.float32).at[:, 16:].set(wp)
    bcat = jnp.concatenate([b1, bp], axis=1)                        # [1, 32]
    # Fold the seq-sum into the MXU by tiling wl S times.
    w_l = jnp.tile(wl, (seq_len, 1)).astype(l_dtype)                # [S*116, 32]
    # dense_2 padded from 2 to 8 output lanes (contiguous small-output DMA).
    w2p = jnp.zeros((32, 8), jnp.float32).at[:, :2].set(w2)
    b2p = jnp.zeros((1, 8), jnp.float32).at[:, :2].set(b2)
    return (w1p, wpp, bcat, w_l, bl.astype(jnp.float32), w2p, b2p)


def _choose_tile_b(B, tile_cap):
    """Batch tile: multiple of 8, divides B (no padding of the dominant l stream),
    <= tile_cap, and giving >= 2 grid steps when possible (v7x megacore)."""
    cap = min(tile_cap, B)
    for upper in (min(cap, B // 2), cap):       # prefer >= 2 grid steps
        t = (upper // 8) * 8
        while t >= 8:
            if B % t == 0:
                return t, 0
            t -= 8
    if B <= tile_cap:
        return B, 0                              # single full-array block
    # Rare fallback: no suitable divisor and B > cap -> pad the batch.
    tb = (cap // 8) * 8
    return tb, (-B) % tb


# ---------------------------------------------------------------------------
# Forward wrapper
# ---------------------------------------------------------------------------
def transformer3_forward(p, enc_inputs, g, f, l, packed_params, tile_b=1024):
    """Pallas forward. `f` is accepted for signature parity but unused (as in PyTorch).
    `packed_params` must come from pack_params(params, seq_len=l.shape[1])."""
    del f  # unused in the reference forward
    w1p, wpp, bcat, w_l, bl, w2p, b2p = packed_params

    B, S, DL = l.shape
    K_L = S * DL
    assert w_l.shape[0] == K_L, "packed_params built for a different seq_len"

    # Flatten seq into lanes: free row-major reshape for a contiguous l.
    l_flat = l.reshape(B, K_L).astype(w_l.dtype)

    tb, pad = _choose_tile_b(B, tile_b)
    enc_in, p_in, g_in, l_in = enc_inputs, p, g, l_flat
    if pad:
        # Fallback only (no divisor tile). Padded rows compute garbage
        # (~ bl @ w2 + b2) and are sliced off by out[:B] below.
        pc = ((0, pad), (0, 0))
        enc_in = jnp.pad(enc_in, pc)
        p_in = jnp.pad(p_in, pc)
        g_in = jnp.pad(g_in, pc)
        l_in = jnp.pad(l_in, pc)
    b_tot = B + pad
    grid = (b_tot // tb,)

    act = lambda n: pl.BlockSpec((tb, n), lambda i: (i, 0))          # batch-tiled
    res = lambda shape: pl.BlockSpec(shape, lambda i: (0, 0))        # resident weights

    # Scoped-VMEM sizing: double-buffered activations/output + resident weights.
    l_isz = jnp.dtype(w_l.dtype).itemsize
    act_bytes = tb * (K_L * l_isz + (192 + 3 + 32 + 8) * 4)
    wt_bytes = K_L * 32 * l_isz + (192 + 3) * 32 * 4 + 3 * 32 * 4 + (32 + 1) * 8 * 4
    vmem_est = 2 * act_bytes + 2 * wt_bytes
    vmem_limit = None
    if vmem_est > (12 << 20):    # would exceed v5e's 16 MiB default scoped VMEM
        vmem_limit = min(max(int(vmem_est * 1.5), 32 << 20), 56 << 20)

    out = pl.pallas_call(
        transformer3_kernel,
        out_shape=jax.ShapeDtypeStruct((b_tot, 8), jnp.float32),
        grid=grid,
        in_specs=[
            act(192),              # enc_inputs
            act(3),                # p
            act(32),               # g
            act(K_L),              # l_flat (dominant HBM stream)
            res((192, 32)),        # w1 packed into cols 0..15
            res((3, 32)),          # wp packed into cols 16..31
            res((1, 32)),          # [b1 | bp]
            res((K_L, 32)),        # wl tiled S times
            res((1, 32)),          # bl
            res((32, 8)),          # w2 padded to 8 cols
            res((1, 8)),           # b2 padded
        ],
        out_specs=pl.BlockSpec((tb, 8), lambda i: (i, 0)),
        compiler_params=pltpu.CompilerParams(
            dimension_semantics=("parallel",),
            vmem_limit_bytes=vmem_limit),
    )(enc_in, p_in, g_in, l_in, w1p, wpp, bcat, w_l, bl, w2p, b2p)

    return out[:B, :2]


# ---------------------------------------------------------------------------
# Params / pure-JAX reference / demo
# ---------------------------------------------------------------------------
def init_params(key):
    ks = jax.random.split(key, 8)
    scale = 0.05
    # stored as (in, out); biases as (1, out) for TPU-friendly 2-D layout
    w1 = scale * jax.random.normal(ks[0], (192, 16), jnp.float32)
    b1 = scale * jax.random.normal(ks[1], (1, 16), jnp.float32)
    wp = scale * jax.random.normal(ks[2], (3, 16), jnp.float32)
    bp = scale * jax.random.normal(ks[3], (1, 16), jnp.float32)
    wl = scale * jax.random.normal(ks[4], (116, 32), jnp.float32)
    bl = scale * jax.random.normal(ks[5], (1, 32), jnp.float32)
    w2 = scale * jax.random.normal(ks[6], (32, 2), jnp.float32)
    b2 = scale * jax.random.normal(ks[7], (1, 2), jnp.float32)
    return (w1, b1, wp, bp, wl, bl, w2, b2)


def reference_forward(p, enc_inputs, g, f, l, params):
    """Pure-JAX reference mirroring the PyTorch module."""
    del f
    w1, b1, wp, bp, wl, bl, w2, b2 = params
    x = enc_inputs @ w1 + b1
    pp = p @ wp + bp
    lo = l.sum(axis=1) @ wl + bl
    f_o = g * jnp.concatenate([x, pp], axis=1) + (1.0 - g) * lo
    return f_o @ w2 + b2


if __name__ == "__main__":
    B, S = 8, 8
    key = jax.random.PRNGKey(0)
    k_p, k_enc, k_g, k_f, k_l, k_w = jax.random.split(key, 6)

    p = jax.random.normal(k_p, (B, 3), jnp.float32)
    enc_inputs = jax.random.normal(k_enc, (B, 192), jnp.float32)
    g = jax.nn.sigmoid(jax.random.normal(k_g, (B, 32), jnp.float32))  # gate in [0,1]
    f = jax.random.normal(k_f, (B, 32), jnp.float32)                  # unused, parity only
    l = jax.random.normal(k_l, (B, S, 116), jnp.float32)

    params = init_params(k_w)
    packed = pack_params(params, seq_len=S)          # hoisted: once, not per call

    fwd = jax.jit(functools.partial(transformer3_forward, tile_b=1024))
    out = jax.block_until_ready(fwd(p, enc_inputs, g, f, l, packed))

    ref = reference_forward(p, enc_inputs, g, f, l, params)
    assert out.shape == (B, 2)
    assert jnp.allclose(out, ref, atol=1e-4, rtol=1e-4), "mismatch vs reference"

    print("KERNEL_OK")
</pallas_src>

<mosaic_0001>
module attributes {stable_mosaic.version = 11 : i64} {
  func.func @transformer3_kernel(%arg0: i32, %arg1: memref<8x192xf32, #tpu.memory_space<vmem>>, %arg2: memref<8x3xf32, #tpu.memory_space<vmem>>, %arg3: memref<8x32xf32, #tpu.memory_space<vmem>>, %arg4: memref<8x928xf32, #tpu.memory_space<vmem>>, %arg5: memref<192x32xf32, #tpu.memory_space<vmem>>, %arg6: memref<3x32xf32, #tpu.memory_space<vmem>>, %arg7: memref<1x32xf32, #tpu.memory_space<vmem>>, %arg8: memref<928x32xf32, #tpu.memory_space<vmem>>, %arg9: memref<1x32xf32, #tpu.memory_space<vmem>>, %arg10: memref<32x8xf32, #tpu.memory_space<vmem>>, %arg11: memref<1x8xf32, #tpu.memory_space<vmem>>, %arg12: memref<8x8xf32, #tpu.memory_space<vmem>>) attributes {dimension_semantics = [#tpu.dimension_semantics<parallel>], iteration_bounds = array<i64: 1>, scalar_prefetch = 0 : i64, scratch_operands = 0 : i64, tpu.core_type = #tpu.core_type<tc>, window_params = [{transform_indices = @transform_0, window_bounds = array<i64: 8, 192>}, {transform_indices = @transform_1, window_bounds = array<i64: 8, 3>}, {transform_indices = @transform_2, window_bounds = array<i64: 8, 32>}, {transform_indices = @transform_3, window_bounds = array<i64: 8, 928>}, {pipeline_mode = #tpu.pipeline_mode<synchronous>, transform_indices = @transform_4, window_bounds = array<i64: 192, 32>}, {pipeline_mode = #tpu.pipeline_mode<synchronous>, transform_indices = @transform_5, window_bounds = array<i64: 3, 32>}, {pipeline_mode = #tpu.pipeline_mode<synchronous>, transform_indices = @transform_6, window_bounds = array<i64: 1, 32>}, {pipeline_mode = #tpu.pipeline_mode<synchronous>, transform_indices = @transform_7, window_bounds = array<i64: 928, 32>}, {pipeline_mode = #tpu.pipeline_mode<synchronous>, transform_indices = @transform_8, window_bounds = array<i64: 1, 32>}, {pipeline_mode = #tpu.pipeline_mode<synchronous>, transform_indices = @transform_9, window_bounds = array<i64: 32, 8>}, {pipeline_mode = #tpu.pipeline_mode<synchronous>, transform_indices = @transform_10, window_bounds = array<i64: 1, 8>}, {transform_indices = @transform_11, window_bounds = array<i64: 8, 8>}]} {
    %c0 = arith.constant 0 : index
    %c0_0 = arith.constant 0 : index
    %0 = vector.load %arg1[%c0, %c0_0] : memref<8x192xf32, #tpu.memory_space<vmem>>, vector<8x192xf32>
    %c0_1 = arith.constant 0 : index
    %c0_2 = arith.constant 0 : index
    %1 = vector.load %arg5[%c0_1, %c0_2] : memref<192x32xf32, #tpu.memory_space<vmem>>, vector<192x32xf32>
    %cst = arith.constant dense<0.000000e+00> : vector<8x32xf32>
    %2 = tpu.matmul %0, %1, %cst {dimension_numbers = #tpu.dot_dimension_numbers<[1], [0], [0], [1], [0, 0, 1, 1], [], []>} : vector<8x192xf32>, vector<192x32xf32>, vector<8x32xf32> -> vector<8x32xf32>
    %c0_3 = arith.constant 0 : index
    %c0_4 = arith.constant 0 : index
    %3 = vector.load %arg2[%c0_3, %c0_4] : memref<8x3xf32, #tpu.memory_space<vmem>>, vector<8x3xf32>
    %c0_5 = arith.constant 0 : index
    %c0_6 = arith.constant 0 : index
    %4 = vector.load %arg6[%c0_5, %c0_6] : memref<3x32xf32, #tpu.memory_space<vmem>>, vector<3x32xf32>
    %cst_7 = arith.constant dense<0.000000e+00> : vector<8x32xf32>
    %5 = tpu.matmul %3, %4, %cst_7 {dimension_numbers = #tpu.dot_dimension_numbers<[1], [0], [0], [1], [0, 0, 1, 1], [], []>} : vector<8x3xf32>, vector<3x32xf32>, vector<8x32xf32> -> vector<8x32xf32>
    %6 = arith.addf %2, %5 : vector<8x32xf32>
    %c0_8 = arith.constant 0 : index
    %c0_9 = arith.constant 0 : index
    %7 = vector.load %arg7[%c0_8, %c0_9] : memref<1x32xf32, #tpu.memory_space<vmem>>, vector<1x32xf32>
    %8 = vector.broadcast %7 : vector<1x32xf32> to vector<8x32xf32>
    %9 = arith.addf %6, %8 : vector<8x32xf32>
    %c0_10 = arith.constant 0 : index
    %c0_11 = arith.constant 0 : index
    %10 = vector.load %arg4[%c0_10, %c0_11] : memref<8x928xf32, #tpu.memory_space<vmem>>, vector<8x928xf32>
    %c0_12 = arith.constant 0 : index
    %c0_13 = arith.constant 0 : index
    %11 = vector.load %arg8[%c0_12, %c0_13] : memref<928x32xf32, #tpu.memory_space<vmem>>, vector<928x32xf32>
    %cst_14 = arith.constant dense<0.000000e+00> : vector<8x32xf32>
    %12 = tpu.matmul %10, %11, %cst_14 {dimension_numbers = #tpu.dot_dimension_numbers<[1], [0], [0], [1], [0, 0, 1, 1], [], []>} : vector<8x928xf32>, vector<928x32xf32>, vector<8x32xf32> -> vector<8x32xf32>
    %c0_15 = arith.constant 0 : index
    %c0_16 = arith.constant 0 : index
    %13 = vector.load %arg9[%c0_15, %c0_16] : memref<1x32xf32, #tpu.memory_space<vmem>>, vector<1x32xf32>
    %14 = vector.broadcast %13 : vector<1x32xf32> to vector<8x32xf32>
    %15 = arith.addf %12, %14 : vector<8x32xf32>
    %c0_17 = arith.constant 0 : index
    %c0_18 = arith.constant 0 : index
    %16 = vector.load %arg3[%c0_17, %c0_18] : memref<8x32xf32, #tpu.memory_space<vmem>>, vector<8x32xf32>
    %17 = arith.mulf %16, %9 : vector<8x32xf32>
    %cst_19 = arith.constant 1.000000e+00 : f32
    %18 = vector.broadcast %cst_19 : f32 to vector<8x32xf32>
    %19 = arith.subf %18, %16 : vector<8x32xf32>
    %20 = arith.mulf %19, %15 : vector<8x32xf32>
    %21 = arith.addf %17, %20 : vector<8x32xf32>
    %c0_20 = arith.constant 0 : index
    %c0_21 = arith.constant 0 : index
    %22 = vector.load %arg10[%c0_20, %c0_21] : memref<32x8xf32, #tpu.memory_space<vmem>>, vector<32x8xf32>
    %cst_22 = arith.constant dense<0.000000e+00> : vector<8x8xf32>
    %23 = tpu.matmul %21, %22, %cst_22 {dimension_numbers = #tpu.dot_dimension_numbers<[1], [0], [0], [1], [0, 0, 1, 1], [], []>} : vector<8x32xf32>, vector<32x8xf32>, vector<8x8xf32> -> vector<8x8xf32>
    %c0_23 = arith.constant 0 : index
    %c0_24 = arith.constant 0 : index
    %24 = vector.load %arg11[%c0_23, %c0_24] : memref<1x8xf32, #tpu.memory_space<vmem>>, vector<1x8xf32>
    %25 = vector.broadcast %24 : vector<1x8xf32> to vector<8x8xf32>
    %26 = arith.addf %23, %25 : vector<8x8xf32>
    %c0_25 = arith.constant 0 : index
    %c0_26 = arith.constant 0 : index
    %27 = vector.load %arg12[%c0_25, %c0_26] : memref<8x8xf32, #tpu.memory_space<vmem>>, vector<8x8xf32>
    tpu.vector_store %arg12[%c0_25, %c0_26], %26 {strides = array<i32>} : memref<8x8xf32, #tpu.memory_space<vmem>>, vector<8x8xf32>,
    return
  }
  func.func @transform_0(%arg0: i32) -> (i32, i32) {
    %c0_i32 = arith.constant 0 : i32
    %c0_i32_0 = arith.constant 0 : i32
    return %arg0, %c0_i32 : i32, i32
  }
  func.func @transform_1(%arg0: i32) -> (i32, i32) {
    %c0_i32 = arith.constant 0 : i32
    %c0_i32_0 = arith.constant 0 : i32
    return %arg0, %c0_i32 : i32, i32
  }
  func.func @transform_2(%arg0: i32) -> (i32, i32) {
    %c0_i32 = arith.constant 0 : i32
    %c0_i32_0 = arith.constant 0 : i32
    return %arg0, %c0_i32 : i32, i32
  }
  func.func @transform_3(%arg0: i32) -> (i32, i32) {
    %c0_i32 = arith.constant 0 : i32
    %c0_i32_0 = arith.constant 0 : i32
    return %arg0, %c0_i32 : i32, i32
  }
  func.func @transform_4(%arg0: i32) -> (i32, i32) {
    %c0_i32 = arith.constant 0 : i32
    %c0_i32_0 = arith.constant 0 : i32
    %c0_i32_1 = arith.constant 0 : i32
    return %c0_i32, %c0_i32_0 : i32, i32
  }
  func.func @transform_5(%arg0: i32) -> (i32, i32) {
    %c0_i32 = arith.constant 0 : i32
    %c0_i32_0 = arith.constant 0 : i32
    %c0_i32_1 = arith.constant 0 : i32
    return %c0_i32, %c0_i32_0 : i32, i32
  }
  func.func @transform_6(%arg0: i32) -> (i32, i32) {
    %c0_i32 = arith.constant 0 : i32
    %c0_i32_0 = arith.constant 0 : i32
    %c0_i32_1 = arith.constant 0 : i32
    return %c0_i32, %c0_i32_0 : i32, i32
  }
  func.func @transform_7(%arg0: i32) -> (i32, i32) {
    %c0_i32 = arith.constant 0 : i32
    %c0_i32_0 = arith.constant 0 : i32
    %c0_i32_1 = arith.constant 0 : i32
    return %c0_i32, %c0_i32_0 : i32, i32
  }
  func.func @transform_8(%arg0: i32) -> (i32, i32) {
    %c0_i32 = arith.constant 0 : i32
    %c0_i32_0 = arith.constant 0 : i32
    %c0_i32_1 = arith.constant 0 : i32
    return %c0_i32, %c0_i32_0 : i32, i32
  }
  func.func @transform_9(%arg0: i32) -> (i32, i32) {
    %c0_i32 = arith.constant 0 : i32
    %c0_i32_0 = arith.constant 0 : i32
    %c0_i32_1 = arith.constant 0 : i32
    return %c0_i32, %c0_i32_0 : i32, i32
  }
  func.func @transform_10(%arg0: i32) -> (i32, i32) {
    %c0_i32 = arith.constant 0 : i32
    %c0_i32_0 = arith.constant 0 : i32
    %c0_i32_1 = arith.constant 0 : i32
    return %c0_i32, %c0_i32_0 : i32, i32
  }
  func.func @transform_11(%arg0: i32) -> (i32, i32) {
    %c0_i32 = arith.constant 0 : i32
    %c0_i32_0 = arith.constant 0 : i32
    return %arg0, %c0_i32 : i32, i32
  }
}

</mosaic_0001>

<bundles_post_ra>
// kernel: transformer3_forward.1
= control target key start
LH: loop header
LB: loop body
LE: loop exit
PB: predicated region body
PF: predicated region fallthrough
CT: control target
= control target key end

     0   :  { %vm70_vm0 = vcmask 1042432   ;;  %v1043_v0 = vmov 0.0   ;;  %vm1044_vm1 = vmmov 0   ;;  %vm66_vm2 = vcmask 23552   ;;  %s1620_s5 = inlined_call_operand.vmem [shape: f32[3,32], index: 5, kind: input, shape index: {}]   ;;  %s1621_s1 = inlined_call_operand.vmem [shape: f32[8,3], index: 1, kind: input, shape index: {}]   ;;  %s1622_s4 = inlined_call_operand.vmem [shape: f32[192,32], index: 4, kind: input, shape index: {}]   ;;  %s1623_s7 = inlined_call_operand.vmem [shape: f32[928,32], index: 7, kind: input, shape index: {}]   ;;  %s1624_s3 = inlined_call_operand.vmem [shape: f32[8,928], index: 3, kind: input, shape index: {}]   ;;  %s1625_s0 = inlined_call_operand.vmem [shape: f32[8,192], index: 0, kind: input, shape index: {}]   ;;  %s1626_s9 = inlined_call_operand.vmem [shape: f32[32,8], index: 9, kind: input, shape index: {}]   ;;  %s1627_s8 = inlined_call_operand.vmem [shape: f32[1,32], index: 8, kind: input, shape index: {}]   ;;  %s1628_s6 = inlined_call_operand.vmem [shape: f32[1,32], index: 6, kind: input, shape index: {}]   ;;  %s1629_s2 = inlined_call_operand.vmem [shape: f32[8,32], index: 2, kind: input, shape index: {}]   ;;  %s1630_s10 = inlined_call_operand.vmem [shape: f32[1,8], index: 10, kind: input, shape index: {}]   ;;  %s1631_s11 = inlined_call_operand.vmem [shape: f32[8,8], index: 11, kind: output, shape index: {}]  }
   0x1   :  { %856 = vmatprep.subr.mxu1 %v1043_v0  ;;  %v65_v1 = vld [vmem:[%s1620_s5] sm:$0x7]  ;;  %858 = vmatprep.mubr.msk.f32.mxu1 %vm1044_vm1, %v1043_v0  ;;  %v41_v4 = vld [vmem:[%s1622_s4 + $0x8] sm:$0xff]  ;;  %v1045_v7 = vmov 0.0|0.0   ;;  %v42_v12 = vld [vmem:[%s1622_s4 + $0x10] sm:$0xff]  ;;  %vm144_vm3 = vcmask 523264  }
   0x2   :  { %v64_v2 = vld [vmem:[%s1621_s1] sm:$0xff]  ;;  %857 = vmatpush3.msk.msra.mxu1 %vm70_vm0, %v65_v1  ;;  %v251_v6 = vld [vmem:[%s1623_s7 + $0x88] sm:$0xff]  ;;  %v43_v14 = vld [vmem:[%s1622_s4 + $0x18] sm:$0xff]  ;;  %vm357_vm4 = vcmask 261120   ;;  %vm730_vm5 = vcmask 64512  }
   0x3   :  { %v40_v3 = vld [vmem:[%s1622_s4] sm:$0xff]  ;;  %872 = vmatprep.subr.bf16.mxu1 %v1045_v7  ;;  %859 = vmatmul.mubr.msk.f32.vlgmr.msra.gmra.mrb[0].mxu1 %vm66_vm2, %v64_v2  ;;  %v235_v11 = vld [vmem:[%s1623_s7 + $0x8] sm:$0xff]  ;;  %v252_v15 = vld [vmem:[%s1623_s7 + $0x90] sm:$0xff]  ;;  %v876_v17 = vpack.c.bf16 %v43_v14, %v42_v12 }
   0x4   :  { %v250_v5 = vld [vmem:[%s1623_s7 + $0x80] sm:$0xff]  ;;  %v873_v8 = vpack.c.bf16 %v41_v4, %v40_v3  ;;  %v253_v16 = vld [vmem:[%s1623_s7 + $0x98] sm:$0xff]  ;;  %v236_v19 = vld [vmem:[%s1623_s7 + $0x10] sm:$0xff] }
   0x5   :  { %v908_v9 = vpack.c.bf16 %v251_v6, %v250_v5  ;;  %v234_v10 = vld [vmem:[%s1623_s7] sm:$0xff]  ;;  %v912_v18 = vpack.c.bf16 %v253_v16, %v252_v15  ;;  %v237_v20 = vld [vmem:[%s1623_s7 + $0x18] sm:$0xff]  ;;  %v45_v23 = vld [vmem:[%s1622_s4 + $0x28] sm:$0xff] }
   0x6   :  { %v910_v13 = vpack.c.bf16 %v235_v11, %v234_v10  ;;  %874 = vmatpush1.bf16.msra.mxu1 %v873_v8  ;;  %v44_v21 = vld [vmem:[%s1622_s4 + $0x20] sm:$0xff]  ;;  %v914_v22 = vpack.c.bf16 %v237_v20, %v236_v19  ;;  %v255_v25 = vld [vmem:[%s1623_s7 + $0xa8] sm:$0xff]  ;;  %v256_v29 = vld [vmem:[%s1623_s7 + $0xb0] sm:$0xff] }
   0x7   :  { %909 = vmatprep.subr.bf16.mxu0 %v908_v9  ;;  %875 = vmatprep.subr.bf16.mxu1 %v1045_v7  ;;  %v254_v24 = vld [vmem:[%s1623_s7 + $0xa0] sm:$0xff]  ;;  %v239_v28 = vld [vmem:[%s1623_s7 + $0x28] sm:$0xff]  ;;  %v257_v30 = vld [vmem:[%s1623_s7 + $0xb8] sm:$0xff]  ;;  %v879_v31 = vpack.c.bf16 %v45_v23, %v44_v21 }
   0x8   :  { %911 = vmatpush3.bf16.msra.mxu0 %v910_v13  ;;  %v916_v26 = vpack.c.bf16 %v255_v25, %v254_v24  ;;  %v238_v27 = vld [vmem:[%s1623_s7 + $0x20] sm:$0xff]  ;;  %v46_v33 = vld [vmem:[%s1622_s4 + $0x30] sm:$0xff]  ;;  %v47_v34 = vld [vmem:[%s1622_s4 + $0x38] sm:$0xff]  ;;  %v920_v35 = vpack.c.bf16 %v257_v30, %v256_v29 }
   0x9   :  { %913 = vmatprep.subr.bf16.mxu0 %v912_v18  ;;  %v918_v32 = vpack.c.bf16 %v239_v28, %v238_v27  ;;  %v240_v36 = vld [vmem:[%s1623_s7 + $0x30] sm:$0xff]  ;;  %v241_v37 = vld [vmem:[%s1623_s7 + $0x38] sm:$0xff]  ;;  %v258_v38 = vld [vmem:[%s1623_s7 + $0xc0] sm:$0xff]  ;;  %v882_v40 = vpack.c.bf16 %v47_v34, %v46_v33 }
   0xa   :  { %877 = vmatpush1.bf16.msra.mxu1 %v876_v17  ;;  %v259_v39 = vld [vmem:[%s1623_s7 + $0xc8] sm:$0xff]  ;;  %v922_v41 = vpack.c.bf16 %v241_v37, %v240_v36  ;;  %v48_v42 = vld [vmem:[%s1622_s4 + $0x40] sm:$0xff]  ;;  %v260_v47 = vld [vmem:[%s1623_s7 + $0xd0] sm:$0xff] }
   0xb   :  { %878 = vmatprep.subr.bf16.mxu1 %v1045_v7  ;;  %v49_v43 = vld [vmem:[%s1622_s4 + $0x48] sm:$0xff]  ;;  %v924_v44 = vpack.c.bf16 %v259_v39, %v258_v38  ;;  %v242_v45 = vld [vmem:[%s1623_s7 + $0x40] sm:$0xff]  ;;  %v261_v48 = vld [vmem:[%s1623_s7 + $0xd8] sm:$0xff] }
   0xc   :  { %915 = vmatpush3.bf16.msra.mxu0 %v914_v22  ;;  %v243_v46 = vld [vmem:[%s1623_s7 + $0x48] sm:$0xff]  ;;  %v885_v49 = vpack.c.bf16 %v49_v43, %v48_v42  ;;  %v50_v52 = vld [vmem:[%s1622_s4 + $0x50] sm:$0xff]  ;;  %v51_v53 = vld [vmem:[%s1622_s4 + $0x58] sm:$0xff]  ;;  %v928_v54 = vpack.c.bf16 %v261_v48, %v260_v47 }
   0xd   :  { %917 = vmatprep.subr.bf16.mxu0 %v916_v26  ;;  %v227_v50 = vld [vmem:[%s1624_s3 + $0x8] sm:$0xff]  ;;  %v926_v51 = vpack.c.bf16 %v243_v46, %v242_v45  ;;  %v244_v55 = vld [vmem:[%s1623_s7 + $0x50] sm:$0xff]  ;;  %v245_v56 = vld [vmem:[%s1623_s7 + $0x58] sm:$0xff]  ;;  %v888_v59 = vpack.c.bf16 %v51_v53, %v50_v52 }
   0xe   :  { %880 = vmatpush1.bf16.msra.mxu1 %v879_v31  ;;  %425 = vmatprep.mubr.f32.mxu0 %v227_v50  ;;  %v262_v57 = vld [vmem:[%s1623_s7 + $0xe0] sm:$0xff]  ;;  %v263_v58 = vld [vmem:[%s1623_s7 + $0xe8] sm:$0xff]  ;;  %v930_v60 = vpack.c.bf16 %v245_v56, %v244_v55  ;;  %v264_v3 = vld [vmem:[%s1623_s7 + $0xf0] sm:$0xff] }
   0xf   :  { %881 = vmatprep.subr.bf16.mxu1 %v1045_v7  ;;  %v52_v61 = vld [vmem:[%s1622_s4 + $0x60] sm:$0xff]  ;;  %v53_v62 = vld [vmem:[%s1622_s4 + $0x68] sm:$0xff]  ;;  %v932_v63 = vpack.c.bf16 %v263_v58, %v262_v57  ;;  %v265_v4 = vld [vmem:[%s1623_s7 + $0xf8] sm:$0xff] }
  0x10   :  { %919 = vmatpush3.bf16.msra.mxu0 %v918_v32  ;;  %v246_v1 = vld [vmem:[%s1623_s7 + $0x60] sm:$0xff]  ;;  %v247_v2 = vld [vmem:[%s1623_s7 + $0x68] sm:$0xff]  ;;  %v891_v5 = vpack.c.bf16 %v53_v62, %v52_v61  ;;  %v54_v8 = vld [vmem:[%s1622_s4 + $0x70] sm:$0xff]  ;;  %v936_v11 = vpack.c.bf16 %v265_v4, %v264_v3 }
  0x11   :  { %921 = vmatprep.subr.bf16.mxu0 %v920_v35  ;;  %v934_v6 = vpack.c.bf16 %v247_v2, %v246_v1  ;;  %v55_v9 = vld [vmem:[%s1622_s4 + $0x78] sm:$0xff]  ;;  %v39_v10 = vld [vmem:[%s1625_s0 + $0x8] sm:$0xff]  ;;  %v248_v12 = vld [vmem:[%s1623_s7 + $0x70] sm:$0xff] }
  0x12   :  { %883 = vmatpush1.bf16.msra.mxu1 %v882_v40  ;;  %v249_v13 = vld [vmem:[%s1623_s7 + $0x78] sm:$0xff]  ;;  %738 = vmatprep.mubr.msk.f32.mxu1 %vm144_vm3, %v39_v10  ;;  %v282_v14 = vld [vmem:[%s1623_s7 + $0x180] sm:$0xff]  ;;  %v283_v15 = vld [vmem:[%s1623_s7 + $0x188] sm:$0xff]  ;;  %v894_v16 = vpack.c.bf16 %v55_v9, %v54_v8 }
  0x13   :  { %884 = vmatprep.subr.bf16.mxu1 %v1045_v7  ;;  %v938_v17 = vpack.c.bf16 %v249_v13, %v248_v12  ;;  %v56_v18 = vld [vmem:[%s1622_s4 + $0x80] sm:$0xff]  ;;  %v57_v19 = vld [vmem:[%s1622_s4 + $0x88] sm:$0xff]  ;;  %v940_v20 = vpack.c.bf16 %v283_v15, %v282_v14  ;;  %v284_v23 = vld [vmem:[%s1623_s7 + $0x190] sm:$0xff] }
  0x14   :  { %923 = vmatpush3.bf16.msra.mxu0 %v922_v41  ;;  %v266_v21 = vld [vmem:[%s1623_s7 + $0x100] sm:$0xff]  ;;  %v267_v22 = vld [vmem:[%s1623_s7 + $0x108] sm:$0xff]  ;;  %v285_v24 = vld [vmem:[%s1623_s7 + $0x198] sm:$0xff]  ;;  %v897_v25 = vpack.c.bf16 %v57_v19, %v56_v18 }
  0x15   :  { %925 = vmatprep.subr.bf16.mxu0 %v924_v44  ;;  %v226_v26 = vld [vmem:[%s1624_s3] sm:$0xff]  ;;  %v942_v27 = vpack.c.bf16 %v267_v22, %v266_v21  ;;  %v58_v28 = vld [vmem:[%s1622_s4 + $0x90] sm:$0xff]  ;;  %v59_v29 = vld [vmem:[%s1622_s4 + $0x98] sm:$0xff]  ;;  %v944_v30 = vpack.c.bf16 %v285_v24, %v284_v23 }
  0x16   :  { %886 = vmatpush1.bf16.msra.mxu1 %v885_v49  ;;  %v268_v31 = vld [vmem:[%s1623_s7 + $0x110] sm:$0xff]  ;;  %v269_v32 = vld [vmem:[%s1623_s7 + $0x118] sm:$0xff]  ;;  %v286_v33 = vld [vmem:[%s1623_s7 + $0x1a0] sm:$0xff]  ;;  %v900_v35 = vpack.c.bf16 %v59_v29, %v58_v28 }
  0x17   :  { %887 = vmatprep.subr.bf16.mxu1 %v1045_v7  ;;  %v287_v34 = vld [vmem:[%s1623_s7 + $0x1a8] sm:$0xff]  ;;  %v229_v36 = vld [vmem:[%s1624_s3 + $0x18] sm:$0xff]  ;;  %v946_v37 = vpack.c.bf16 %v269_v32, %v268_v31  ;;  %v60_v38 = vld [vmem:[%s1622_s4 + $0xa0] sm:$0xff] }
  0x18   :  { %927 = vmatpush3.bf16.msra.mxu0 %v926_v51  ;;  %v61_v39 = vld [vmem:[%s1622_s4 + $0xa8] sm:$0xff]  ;;  %v948_v40 = vpack.c.bf16 %v287_v34, %v286_v33  ;;  %v270_v41 = vld [vmem:[%s1623_s7 + $0x120] sm:$0xff]  ;;  %v288_v43 = vld [vmem:[%s1623_s7 + $0x1b0] sm:$0xff] }
  0x19   :  { %929 = vmatprep.subr.bf16.mxu0 %v928_v54  ;;  %v271_v42 = vld [vmem:[%s1623_s7 + $0x128] sm:$0xff]  ;;  %v289_v44 = vld [vmem:[%s1623_s7 + $0x1b8] sm:$0xff]  ;;  %v903_v45 = vpack.c.bf16 %v61_v39, %v60_v38  ;;  %v62_v47 = vld [vmem:[%s1622_s4 + $0xb0] sm:$0xff] }
  0x1a   :  { %889 = vmatpush1.bf16.msra.mxu1 %v888_v59  ;;  %v950_v46 = vpack.c.bf16 %v271_v42, %v270_v41  ;;  %v63_v48 = vld [vmem:[%s1622_s4 + $0xb8] sm:$0xff]  ;;  %v272_v49 = vld [vmem:[%s1623_s7 + $0x130] sm:$0xff]  ;;  %v952_v50 = vpack.c.bf16 %v289_v44, %v288_v43  ;;  %v314_v52 = vld [vmem:[%s1623_s7 + $0x280] sm:$0xff] }
  0x1b   :  { %890 = vmatprep.subr.bf16.mxu1 %v1045_v7  ;;  %v273_v51 = vld [vmem:[%s1623_s7 + $0x138] sm:$0xff]  ;;  %v315_v53 = vld [vmem:[%s1623_s7 + $0x288] sm:$0xff]  ;;  %v290_v54 = vld [vmem:[%s1623_s7 + $0x1c0] sm:$0xff]  ;;  %v906_v56 = vpack.c.bf16 %v63_v48, %v62_v47 }
  0x1c   :  { %931 = vmatpush3.bf16.msra.mxu0 %v930_v60  ;;  %v291_v55 = vld [vmem:[%s1623_s7 + $0x1c8] sm:$0xff]  ;;  %v954_v57 = vpack.c.bf16 %v273_v51, %v272_v49  ;;  %v972_v58 = vpack.c.bf16 %v315_v53, %v314_v52  ;;  %v298_v59 = vld [vmem:[%s1623_s7 + $0x200] sm:$0xff]  ;;  %v316_v1 = vld [vmem:[%s1623_s7 + $0x290] sm:$0xff] }
  0x1d   :  { %933 = vmatprep.subr.bf16.mxu0 %v932_v63  ;;  %v299_v60 = vld [vmem:[%s1623_s7 + $0x208] sm:$0xff]  ;;  %v274_v61 = vld [vmem:[%s1623_s7 + $0x140] sm:$0xff]  ;;  %v956_v62 = vpack.c.bf16 %v291_v55, %v290_v54  ;;  %v317_v2 = vld [vmem:[%s1623_s7 + $0x298] sm:$0xff] }
  0x1e   :  { %892 = vmatpush1.bf16.msra.mxu1 %v891_v5  ;;  %v275_v63 = vld [vmem:[%s1623_s7 + $0x148] sm:$0xff]  ;;  %v292_v3 = vld [vmem:[%s1623_s7 + $0x1d0] sm:$0xff]  ;;  %v293_v4 = vld [vmem:[%s1623_s7 + $0x1d8] sm:$0xff]  ;;  %v976_v10 = vpack.c.bf16 %v317_v2, %v316_v1 }
  0x1f   :  { %893 = vmatprep.subr.bf16.mxu1 %v1045_v7  ;;  %v38_v5 = vld [vmem:[%s1625_s0] sm:$0xff]  ;;  %v300_v8 = vld [vmem:[%s1623_s7 + $0x210] sm:$0xff]  ;;  %v958_v9 = vpack.c.bf16 %v275_v63, %v274_v61  ;;  %v231_v13 = vld [vmem:[%s1624_s3 + $0x28] sm:$0xff]  ;;  %v960_v14 = vpack.c.bf16 %v293_v4, %v292_v3 }
  0x20   :  { %935 = vmatpush3.bf16.msra.mxu0 %v934_v6  ;;  %v974_v6 = vpack.c.bf16 %v299_v60, %v298_v59  ;;  %v276_v12 = vld [vmem:[%s1623_s7 + $0x150] sm:$0xff]  ;;  %v277_v15 = vld [vmem:[%s1623_s7 + $0x158] sm:$0xff]  ;;  %v294_v18 = vld [vmem:[%s1623_s7 + $0x1e0] sm:$0xff] }
  0x21   :  { %937 = vmatprep.subr.bf16.mxu0 %v936_v11  ;;  %v301_v11 = vld [vmem:[%s1623_s7 + $0x218] sm:$0xff]  ;;  %v295_v19 = vld [vmem:[%s1623_s7 + $0x1e8] sm:$0xff]  ;;  %v962_v21 = vpack.c.bf16 %v277_v15, %v276_v12  ;;  %v302_v23 = vld [vmem:[%s1623_s7 + $0x220] sm:$0xff] }
  0x22   :  { %895 = vmatpush1.bf16.msra.mxu1 %v894_v16  ;;  %v318_v16 = vld [vmem:[%s1623_s7 + $0x2a0] sm:$0xff]  ;;  %v303_v24 = vld [vmem:[%s1623_s7 + $0x228] sm:$0xff]  ;;  %v320_v28 = vld [vmem:[%s1623_s7 + $0x2b0] sm:$0xff] }
  0x23   :  { %896 = vmatprep.subr.bf16.mxu1 %v1045_v7  ;;  %v321_v29 = vld [vmem:[%s1623_s7 + $0x2b8] sm:$0xff]  ;;  %v982_v32 = vpack.c.bf16 %v303_v24, %v302_v23  ;;  %v323_v41 = vld [vmem:[%s1623_s7 + $0x2c8] sm:$0xff]  ;;  %v330_v47 = vld [vmem:[%s1623_s7 + $0x300] sm:$0xff] }
  0x24   :  { %939 = vmatpush3.bf16.msra.mxu0 %v938_v17  ;;  %v319_v17 = vld [vmem:[%s1623_s7 + $0x2a8] sm:$0xff]  ;;  %v297_v31 = vld [vmem:[%s1623_s7 + $0x1f8] sm:$0xff]  ;;  %v984_v34 = vpack.c.bf16 %v321_v29, %v320_v28  ;;  %v324_v49 = vld [vmem:[%s1623_s7 + $0x2d0] sm:$0xff] }
  0x25   :  { %941 = vmatprep.subr.bf16.mxu0 %v940_v20  ;;  %v978_v20 = vpack.c.bf16 %v301_v11, %v300_v8  ;;  %v980_v22 = vpack.c.bf16 %v319_v17, %v318_v16  ;;  %v281_v39 = vld [vmem:[%s1623_s7 + $0x178] sm:$0xff]  ;;  %v331_v48 = vld [vmem:[%s1623_s7 + $0x308] sm:$0xff]  ;;  %v228_v51 = vld [vmem:[%s1624_s3 + $0x10] sm:$0xff] }
  0x26   :  { %898 = vmatpush1.bf16.msra.mxu1 %v897_v25  ;;  %v278_v25 = vld [vmem:[%s1623_s7 + $0x160] sm:$0xff]  ;;  %v1005_v53 = vpack.c.bf16 %v331_v48, %v330_v47  ;;  %v308_v55 = vld [vmem:[%s1623_s7 + $0x250] sm:$0xff]  ;;  %v327_v60 = vld [vmem:[%s1623_s7 + $0x2e8] sm:$0xff] }
  0x27   :  { %426 = vmatmul.mubr.f32.vlgmr.msra.gmra.mrb[0].mxu0 %v226_v26  ;;  %899 = vmatprep.subr.bf16.mxu1 %v1045_v7  ;;  %v964_v26 = vpack.c.bf16 %v295_v19, %v294_v18  ;;  %v326_v59 = vld [vmem:[%s1623_s7 + $0x2e0] sm:$0xff]  ;;  %v233_v61 = vld [vmem:[%s1624_s3 + $0x38] sm:$0xff]  ;;  %v311_v3 = vld [vmem:[%s1623_s7 + $0x268] sm:$0xff] }
  0x28   :  { %943 = vmatpush3.bf16.msra.mxu0 %v942_v27  ;;  %495 = vmatprep.mubr.f32.mxu0 %v229_v36  ;;  %v279_v27 = vld [vmem:[%s1623_s7 + $0x168] sm:$0xff]  ;;  %v305_v36 = vld [vmem:[%s1623_s7 + $0x238] sm:$0xff]  ;;  %v996_v1 = vpack.c.bf16 %v327_v60, %v326_v59  ;;  %v310_v2 = vld [vmem:[%s1623_s7 + $0x260] sm:$0xff] }
  0x29   :  { %945 = vmatprep.subr.bf16.mxu0 %v944_v30  ;;  %v296_v30 = vld [vmem:[%s1623_s7 + $0x1f0] sm:$0xff]  ;;  %v966_v33 = vpack.c.bf16 %v279_v27, %v278_v25  ;;  %v334_v4 = vld [vmem:[%s1623_s7 + $0x320] sm:$0xff]  ;;  %v329_v8 = vld [vmem:[%s1623_s7 + $0x2f8] sm:$0xff] }
  0x2a   :  { %901 = vmatpush1.bf16.msra.mxu1 %v900_v35  ;;  %v304_v35 = vld [vmem:[%s1623_s7 + $0x230] sm:$0xff]  ;;  %v968_v38 = vpack.c.bf16 %v297_v31, %v296_v30  ;;  %v337_v15 = vld [vmem:[%s1623_s7 + $0x338] sm:$0xff]  ;;  %v338_v18 = vld [vmem:[%s1623_s7 + $0x340] sm:$0xff] }
  0x2b   :  { %902 = vmatprep.subr.bf16.mxu1 %v1045_v7  ;;  %v986_v42 = vpack.c.bf16 %v305_v36, %v304_v35  ;;  %v312_v12 = vld [vmem:[%s1623_s7 + $0x270] sm:$0xff]  ;;  %v339_v19 = vld [vmem:[%s1623_s7 + $0x348] sm:$0xff]  ;;  %v341_v23 = vld [vmem:[%s1623_s7 + $0x358] sm:$0xff] }
  0x2c   :  { %947 = vmatpush3.bf16.msra.mxu0 %v946_v37  ;;  %v280_v37 = vld [vmem:[%s1623_s7 + $0x170] sm:$0xff]  ;;  %v342_v25 = vld [vmem:[%s1623_s7 + $0x360] sm:$0xff]  ;;  %v345_v28 = vld [vmem:[%s1623_s7 + $0x378] sm:$0xff] }
  0x2d   :  { %949 = vmatprep.subr.bf16.mxu0 %v948_v40  ;;  %v322_v40 = vld [vmem:[%s1623_s7 + $0x2c0] sm:$0xff]  ;;  %v970_v43 = vpack.c.bf16 %v281_v39, %v280_v37  ;;  %v347_v31 = vld [vmem:[%s1623_s7 + $0x388] sm:$0xff]  ;;  %v232_v36 = vld [vmem:[%s1624_s3 + $0x30] sm:$0xff] }
  0x2e   :  { %904 = vmatpush1.bf16.msra.mxu1 %v903_v45  ;;  %v988_v44 = vpack.c.bf16 %v323_v41, %v322_v40  ;;  %v306_v45 = vld [vmem:[%s1623_s7 + $0x240] sm:$0xff]  ;;  %v648_v40 = vld [vmem:[%s1626_s9 + $0x10] sm:$0xff]  ;;  %v649_v41 = vld [vmem:[%s1626_s9 + $0x18] sm:$0xff] }
  0x2f   :  { %905 = vmatprep.subr.bf16.mxu1 %v1045_v7  ;;  %v346_v30 = vld [vmem:[%s1623_s7 + $0x380] sm:$0xff] }
  0x30   :  { %951 = vmatpush3.bf16.msra.mxu0 %v950_v46  ;;  %v307_v46 = vld [vmem:[%s1623_s7 + $0x248] sm:$0xff]  ;;  %v646_v37 = vld [vmem:[%s1626_s9] sm:$0xff] }
  0x31   :  { %953 = vmatprep.subr.bf16.mxu0 %v952_v50  ;;  %v325_v50 = vld [vmem:[%s1623_s7 + $0x2d8] sm:$0xff]  ;;  %v990_v52 = vpack.c.bf16 %v307_v46, %v306_v45  ;;  %v739_v60 = vld [vmem:[%s1628_s6] ss:$0 sm:$0xff] }
  0x32   :  { %907 = vmatpush1.bf16.msra.mxu1 %v906_v56  ;;  %v992_v54 = vpack.c.bf16 %v325_v50, %v324_v49  ;;  %v309_v56 = vld [vmem:[%s1623_s7 + $0x258] sm:$0xff] }
  0x33   :  { %973 = vmatprep.subr.bf16.mxu1 %v972_v58  ;;  %v333_v58 = vld [vmem:[%s1623_s7 + $0x318] sm:$0xff] }
  0x34   :  { %955 = vmatpush3.bf16.msra.mxu0 %v954_v57  ;;  %v332_v57 = vld [vmem:[%s1623_s7 + $0x310] sm:$0xff] }
  0x35   :  { %957 = vmatprep.subr.bf16.mxu0 %v956_v62  ;;  %213 = vmatmul.mubr.f32.vlgmr.msra.gmra.mrb[2].mxu1 %v38_v5  ;;  %v994_v62 = vpack.c.bf16 %v309_v56, %v308_v55  ;;  %v1008_v63 = vpack.c.bf16 %v333_v58, %v332_v57  ;;  %v335_v5 = vld [vmem:[%s1623_s7 + $0x328] sm:$0xff] }
  0x36   :  { %975 = vmatpush3.bf16.msra.mxu1 %v974_v6  ;;  %565 = vmatprep.mubr.f32.mxu1 %v231_v13  ;;  %v328_v6 = vld [vmem:[%s1623_s7 + $0x2f0] sm:$0xff]  ;;  %v313_v13 = vld [vmem:[%s1623_s7 + $0x278] sm:$0xff] }
  0x37   :  { %977 = vmatprep.subr.bf16.mxu1 %v976_v10  ;;  %v1011_v10 = vpack.c.bf16 %v335_v5, %v334_v4  ;;  %v1000_v11 = vpack.c.bf16 %v329_v8, %v328_v6  ;;  %v1002_v16 = vpack.c.bf16 %v313_v13, %v312_v12  ;;  %v742_v8 = vld [vmem:[%s1630_s10] ss:$0 sm:$0xff] }
  0x38   :  { %959 = vmatpush3.bf16.msra.mxu0 %v958_v9  ;;  %v998_v9 = vpack.c.bf16 %v311_v3, %v310_v2 }
  0x39   :  { %961 = vmatprep.subr.bf16.mxu0 %v960_v14  ;;  %v336_v14 = vld [vmem:[%s1623_s7 + $0x330] sm:$0xff] }
  0x3a   :  { %979 = vmatpush3.bf16.msra.mxu1 %v978_v20  ;;  %v1014_v17 = vpack.c.bf16 %v337_v15, %v336_v14  ;;  %v230_v20 = vld [vmem:[%s1624_s3 + $0x20] sm:$0xff] }
  0x3b   :  { %981 = vmatprep.subr.bf16.mxu1 %v980_v22  ;;  %v340_v22 = vld [vmem:[%s1623_s7 + $0x350] sm:$0xff] }
  0x3c   :  { %963 = vmatpush3.bf16.msra.mxu0 %v962_v21  ;;  %v1017_v21 = vpack.c.bf16 %v339_v19, %v338_v18  ;;  %v1020_v24 = vpack.c.bf16 %v341_v23, %v340_v22 }
  0x3d   :  { %965 = vmatprep.subr.bf16.mxu0 %v964_v26  ;;  %v343_v26 = vld [vmem:[%s1623_s7 + $0x368] sm:$0xff] }
  0x3e   :  { %983 = vmatpush3.bf16.msra.mxu1 %v982_v32  ;;  %v1023_v27 = vpack.c.bf16 %v343_v26, %v342_v25  ;;  %v1029_v32 = vpack.c.bf16 %v347_v31, %v346_v30 }
  0x3f   :  { %985 = vmatprep.subr.bf16.mxu1 %v984_v34  ;;  %v349_v34 = vld [vmem:[%s1623_s7 + $0x398] sm:$0xff] }
  0x40   :  { %967 = vmatpush3.bf16.msra.mxu0 %v966_v33  ;;  %v348_v33 = vld [vmem:[%s1623_s7 + $0x390] sm:$0xff] }
  0x41   :  { %969 = vmatprep.subr.bf16.mxu0 %v968_v38  ;;  %v1032_v35 = vpack.c.bf16 %v349_v34, %v348_v33  ;;  %v647_v38 = vld [vmem:[%s1626_s9 + $0x8] sm:$0xff] }
  0x42   :  { %987 = vmatpush3.bf16.msra.mxu1 %v986_v42  ;;  %v1035_v39 = vpack.c.bf16 %v647_v38, %v646_v37  ;;  %v1038_v42 = vpack.c.bf16 %v649_v41, %v648_v40 }
  0x43   :  { %989 = vmatprep.subr.bf16.mxu1 %v988_v44 }
  0x44   :  { %971 = vmatpush3.bf16.msra.mxu0 %v970_v43 }
  0x45   :  { %1004 = vmatprep.subr.bf16.mxu0 %v1045_v7 }
  0x46   :  { %991 = vmatpush3.bf16.msra.mxu1 %v990_v52 }
  0x47   :  { %496 = vmatmul.mubr.f32.vlgmr.msra.gmra.mrb[2].mxu0 %v228_v51  ;;  %993 = vmatprep.subr.bf16.mxu1 %v992_v54 }
  0x48   :  { %1006 = vmatpush1.bf16.msra.mxu0 %v1005_v53  ;;  %741 = vmatprep.mubr.msk.f32.mxu0 %vm357_vm4, %v233_v61  ;;  %v641_v61 = vld [vmem:[%s1629_s2] sm:$0xff] }
  0x49   :  { %1007 = vmatprep.subr.bf16.mxu0 %v1045_v7 }
  0x4a   :  { %995 = vmatpush3.bf16.msra.mxu1 %v994_v62 }
  0x4b   :  { %997 = vmatprep.subr.bf16.mxu1 %v996_v1 }
  0x4c   :  { %1009 = vmatpush1.bf16.msra.mxu0 %v1008_v63  ;;  %v643_v63 = vsub.f32 1.0, %v641_v61 }
  0x4d   :  { %1010 = vmatprep.subr.bf16.mxu0 %v1045_v7 }
  0x4e   :  { %999 = vmatpush3.bf16.msra.mxu1 %v998_v9 }
  0x4f   :  { %1001 = vmatprep.subr.bf16.mxu1 %v1000_v11 }
  0x50   :  { %1012 = vmatpush1.bf16.msra.mxu0 %v1011_v10 }
  0x51   :  { %1013 = vmatprep.subr.bf16.mxu0 %v1045_v7 }
  0x52   :  { %1003 = vmatpush3.bf16.msra.mxu1 %v1002_v16 }
  0x53   :  { %1034 = vmatprep.subr.bf16.mxu1 %v1045_v7 }
  0x54   :  { %1015 = vmatpush1.bf16.msra.mxu0 %v1014_v17 }
  0x55   :  { %1016 = vmatprep.subr.bf16.mxu0 %v1045_v7  ;;  %566 = vmatmul.mubr.f32.vlgmr.msra.gmra.mrb[4].mxu1 %v230_v20 }
  0x56   :  { %869 = vmatprep.mubr.msk.f32.mxu1 %vm1044_vm1, %v1043_v0  ;;  %v344_v0 = vld [vmem:[%s1623_s7 + $0x370] sm:$0xff]  ;;  %1036 = vmatpush3.bf16.msra.mxu1 %v1035_v39 }
  0x57   :  { %v1026_v29 = vpack.c.bf16 %v345_v28, %v344_v0  ;;  %1037 = vmatprep.subr.bf16.mxu1 %v1045_v7 }
  0x58   :  { %1018 = vmatpush1.bf16.msra.mxu0 %v1017_v21 }
  0x59   :  { %1019 = vmatprep.subr.bf16.mxu0 %v1045_v7 }
  0x5a   :  { %1039 = vmatpush3.bf16.msra.mxu1 %v1038_v42 }
  0x5c   :  { %1021 = vmatpush1.bf16.msra.mxu0 %v1020_v24 }
  0x5d   :  { %1022 = vmatprep.subr.bf16.mxu0 %v1045_v7 }
  0x60   :  { %1024 = vmatpush1.bf16.msra.mxu0 %v1023_v27 }
  0x61   :  { %1025 = vmatprep.subr.bf16.mxu0 %v1045_v7 }
  0x64   :  { %1027 = vmatpush1.bf16.msra.mxu0 %v1026_v29 }
  0x65   :  { %1028 = vmatprep.subr.bf16.mxu0 %v1045_v7 }
  0x68   :  { %1030 = vmatpush1.bf16.msra.mxu0 %v1029_v32 }
  0x69   :  { %1031 = vmatprep.subr.bf16.mxu0 %v1045_v7  ;;  %v740_v7 = vld [vmem:[%s1627_s8] ss:$0 sm:$0xff] }
  0x6c   :  { %1033 = vmatpush1.bf16.msra.mxu0 %v1032_v35 }
  0x6f   :  { %636 = vmatmul.mubr.f32.vlgmr.msra.gmra.mrb[4].mxu0 %v232_v36 }
  0xd6   :  { %v140_v43 = vpop.f32.mrb[0].mxu1 }
  0xd7   :  { %v860_v44 = vpop.f32.mrb[1].mxu1 }
  0xfa   :  { %v778_v45 = vpop.f32.mrb[0].mxu0 }
  0xfb   :  { %v779_v46 = vpop.f32.mrb[1].mxu0 }
  0xfc   :  { %v780_v47 = vadd.f32 %v779_v46, %v778_v45 }
  0xfe   :  { %v428_v53 = vadd.f32 %v780_v47, %v740_v7 }
 0x108   :  { %v214_v48 = vpop.f32.mrb[2].mxu1 }
 0x109   :  { %v215_v49 = vadd.f32 %v214_v48, %v140_v43  ;;  %v216_v50 = vpop.f32.mrb[3].mxu1 }
 0x10b   :  { %v225_v62 = vadd.f32 %v739_v60, %v215_v49 }
 0x10d   :  { %v642_v4 = vmul.f32 %v641_v61, %v225_v62 }
 0x11a   :  { %v813_v51 = vpop.f32.mrb[2].mxu0 }
 0x11b   :  { %v814_v52 = vpop.f32.mrb[3].mxu0 }
 0x11c   :  { %v815_v54 = vadd.f32 %v814_v52, %v813_v51 }
 0x11e   :  { %v498_v55 = vadd.f32 %v815_v54, %v428_v53 }
 0x128   :  { %v848_v56 = vpop.f32.mrb[4].mxu1 }
 0x129   :  { %v849_v57 = vpop.f32.mrb[5].mxu1 }
 0x12a   :  { %v850_v58 = vadd.f32 %v849_v57, %v848_v56 }
 0x12c   :  { %v568_v59 = vadd.f32 %v850_v58, %v498_v55 }
 0x142   :  { %v637_v1 = vpop.f32.mrb[4].mxu0 }
 0x143   :  { %v638_v2 = vadd.f32 %v637_v1, %v568_v59  ;;  %v639_v3 = vpop.f32.mrb[5].mxu0 }
 0x145   :  { %v644_v5 = vmul.f32 %v643_v63, %v638_v2 }
 0x147   :  { %v645_v6 = vadd.f32 %v644_v5, %v642_v4 }
 0x149   :  { %870 = vmatmul.mubr.msk.f32.vlgmr.msra.gmra.mrb[6].mxu1 %vm357_vm4, %v645_v6 }
 0x21c   :  { %v726_v9 = vpop.f32.mrb[6].mxu1 }
 0x21d   :  { %v727_v10 = vadd.f32 %v742_v8, %v726_v9  ;;  %v871_v11 = vpop.f32.mrb[7].mxu1 }
 0x21f   :  { %731 = vst.msk [vmem:[%s1631_s11] sm:$0xff] %vm730_vm5, %v727_v10 }

</bundles_post_ra>
